<compile_context>
chip_gen: v7x
topology: tpu7x:2x2x1
jax: 0.10.0
libtpu: 0.0.40
codegen_flags: <defaults>
</compile_context>

<pallas_src>
import functools

import jax
import jax.numpy as jnp
from jax.experimental import pallas as pl
from jax.experimental.pallas import tpu as pltpu


def _round_up(n, m):
    return (n + m - 1) // m * m


def _mlp_kernel(x_ref, w1_ref, b1_ref, w2_ref, b2_ref, o_ref):
    # In-kernel bf16 downcast of activations (avoids a separate XLA pass over x).
    x = x_ref[...].astype(jnp.bfloat16)
    # Hidden layer: bf16 operands on the MXU, f32 accumulation.
    h = jnp.dot(x, w1_ref[...], preferred_element_type=jnp.float32)
    # Bias + ReLU in f32 on the VPU (padded hidden columns stay exactly 0).
    h = jnp.maximum(h + b1_ref[...], 0.0)
    # Output layer: deliberate bf16 downcast of activations for the MXU, f32 acc.
    out = jnp.dot(h.astype(jnp.bfloat16), w2_ref[...],
                  preferred_element_type=jnp.float32)
    o_ref[...] = (out + b2_ref[...]).astype(o_ref.dtype)


def init_linear_params(key, in_dim, out_dim, dtype=jnp.float32):
    """Matches torch.nn.Linear default init: U(-1/sqrt(in_dim), 1/sqrt(in_dim))."""
    kw, kb = jax.random.split(key)
    bound = 1.0 / jnp.sqrt(jnp.asarray(in_dim, dtype))
    # Stored as (in_dim, out_dim) = transpose of torch's (out_dim, in_dim).
    w = jax.random.uniform(kw, (in_dim, out_dim), dtype, minval=-bound, maxval=bound)
    b = jax.random.uniform(kb, (1, out_dim), dtype, minval=-bound, maxval=bound)
    return w, b


def prepare_params(w1, b1, w2, b2, lane=128):
    """One-time (init) lane-padding to multiples of 128 + bf16 cast of weights."""
    in_dim, hid = w1.shape
    _, ncls = w2.shape
    hid_p = _round_up(hid, lane)
    cls_p = _round_up(ncls, lane)
    w1_p = jnp.zeros((in_dim, hid_p), jnp.bfloat16).at[:, :hid].set(
        w1.astype(jnp.bfloat16))
    b1_p = jnp.zeros((1, hid_p), jnp.float32).at[:, :hid].set(b1)
    w2_p = jnp.zeros((hid_p, cls_p), jnp.bfloat16).at[:hid, :ncls].set(
        w2.astype(jnp.bfloat16))
    b2_p = jnp.zeros((1, cls_p), jnp.float32).at[:, :ncls].set(b2)
    return w1_p, b1_p, w2_p, b2_p, ncls


def _pick_tile_m(batch, cap=1024):
    """Batch tile: multiple of 8 sublanes, <= `cap` rows.

    For large batches, force >= 2 balanced grid steps so the batch axis
    (dimension_semantics="parallel") can be sharded across v7x's two
    TensorCores; harmless single-core loop on v5e/v6e.
    Even at 1024 rows the double-buffered tiles are ~1.3 MiB (x f32 128 KiB,
    out f32 512 KiB, each x2) + ~50 KiB resident weights -> well inside the
    default scoped VMEM on every generation, no vmem_limit_bytes needed.
    """
    if batch <= 512:
        return _round_up(batch, 8)
    n_steps = max(2, pl.cdiv(batch, cap))
    return _round_up(pl.cdiv(batch, n_steps), 8)


@functools.partial(jax.jit, static_argnames=("num_classes",))
def mlp_forward(x, w1_p, b1_p, w2_p, b2_p, *, num_classes):
    """x: (B, input_dim) f32; padded/bf16 params from prepare_params -> (B, num_classes) f32."""
    B, in_dim = x.shape
    hid_p = w1_p.shape[1]
    cls_p = w2_p.shape[1]

    tile_m = _pick_tile_m(B)
    grid = (pl.cdiv(B, tile_m),)   # ragged last block handled by Pallas (no jnp.pad)

    flops = 2 * B * (in_dim * hid_p + hid_p * cls_p)
    bytes_accessed = (x.size * 4 + w1_p.size * 2 + w2_p.size * 2
                      + b1_p.size * 4 + b2_p.size * 4 + B * cls_p * 4)

    out_pad = pl.pallas_call(
        _mlp_kernel,
        out_shape=jax.ShapeDtypeStruct((B, cls_p), jnp.float32),
        grid=grid,
        in_specs=[
            # Batch-tiled activations (f32; cast to bf16 inside the kernel).
            pl.BlockSpec((tile_m, in_dim), lambda i: (i, 0)),
            # Weights / biases: same block every step -> stay VMEM-resident.
            pl.BlockSpec((in_dim, hid_p), lambda i: (0, 0)),
            pl.BlockSpec((1, hid_p), lambda i: (0, 0)),
            pl.BlockSpec((hid_p, cls_p), lambda i: (0, 0)),
            pl.BlockSpec((1, cls_p), lambda i: (0, 0)),
        ],
        out_specs=pl.BlockSpec((tile_m, cls_p), lambda i: (i, 0)),
        compiler_params=pltpu.CompilerParams(
            dimension_semantics=("parallel",)),
        cost_estimate=pl.CostEstimate(
            flops=flops, transcendentals=0, bytes_accessed=bytes_accessed),
    )(x, w1_p, b1_p, w2_p, b2_p)

    # Slice away only the padded class columns (lane padding), outside the kernel.
    # TODO(synk): downstream softmax/loss could consume the padded (B, 128)
    # logits directly (with -inf-padded b2) to skip this extra pass.
    return out_pad[:, :num_classes]


def _reference_bf16(x, w1, b1, w2, b2):
    """Reference with bf16-rounded MXU operands, f32 accumulation (matches kernel)."""
    f32 = jnp.float32
    x_bf = x.astype(jnp.bfloat16).astype(f32)
    w1_bf = w1.astype(jnp.bfloat16).astype(f32)
    w2_bf = w2.astype(jnp.bfloat16).astype(f32)
    h = jnp.maximum(x_bf @ w1_bf + b1, 0.0)
    return h.astype(jnp.bfloat16).astype(f32) @ w2_bf + b2


if __name__ == "__main__":
    # Module config: MultiClassMLP(input_dim=32, hidden_dims=[100], num_classes=70).
    input_dim = 32
    hidden_dim = 100
    num_classes = 70

    key = jax.random.PRNGKey(0)
    kx, kx2, k1, k2 = jax.random.split(key, 4)

    w1, b1 = init_linear_params(k1, input_dim, hidden_dim)
    w2, b2 = init_linear_params(k2, hidden_dim, num_classes)
    # One-time padding + bf16 cast (init time, not per forward).
    w1_p, b1_p, w2_p, b2_p, ncls = prepare_params(w1, b1, w2, b2)

    # --- Small batch (single grid step) ---
    batch = 8
    x = jax.random.normal(kx, (batch, input_dim), jnp.float32)
    logits = mlp_forward(x, w1_p, b1_p, w2_p, b2_p, num_classes=ncls)
    jax.block_until_ready(logits)
    assert logits.shape == (batch, num_classes)

    ref_bf = _reference_bf16(x, w1, b1, w2, b2)
    assert jnp.allclose(logits, ref_bf, atol=2e-3, rtol=2e-3)
    # Sanity vs the original f32 math (loose bound for bf16 quantization).
    ref_f32 = jnp.maximum(x @ w1 + b1, 0.0) @ w2 + b2
    assert jnp.allclose(logits, ref_f32, atol=7e-2, rtol=7e-2)

    # --- Larger batch: exercises multi-step grid + ragged last block ---
    batch2 = 600  # > 512 -> 2 balanced grid steps, last block partial
    x2 = jax.random.normal(kx2, (batch2, input_dim), jnp.float32)
    logits2 = mlp_forward(x2, w1_p, b1_p, w2_p, b2_p, num_classes=ncls)
    jax.block_until_ready(logits2)
    assert logits2.shape == (batch2, num_classes)
    ref_bf2 = _reference_bf16(x2, w1, b1, w2, b2)
    assert jnp.allclose(logits2, ref_bf2, atol=2e-3, rtol=2e-3)

    print("KERNEL_OK")
</pallas_src>

<mosaic_0001>
module attributes {stable_mosaic.version = 11 : i64} {
  func.func @_mlp_kernel(%arg0: i32, %arg1: memref<8x32xf32, #tpu.memory_space<vmem>>, %arg2: memref<32x128xbf16, #tpu.memory_space<vmem>>, %arg3: memref<1x128xf32, #tpu.memory_space<vmem>>, %arg4: memref<128x128xbf16, #tpu.memory_space<vmem>>, %arg5: memref<1x128xf32, #tpu.memory_space<vmem>>, %arg6: memref<8x128xf32, #tpu.memory_space<vmem>>) attributes {dimension_semantics = [#tpu.dimension_semantics<parallel>], iteration_bounds = array<i64: 1>, scalar_prefetch = 0 : i64, scratch_operands = 0 : i64, tpu.core_type = #tpu.core_type<tc>, window_params = [{transform_indices = @transform_0, window_bounds = array<i64: 8, 32>}, {pipeline_mode = #tpu.pipeline_mode<synchronous>, transform_indices = @transform_1, window_bounds = array<i64: 32, 128>}, {pipeline_mode = #tpu.pipeline_mode<synchronous>, transform_indices = @transform_2, window_bounds = array<i64: 1, 128>}, {pipeline_mode = #tpu.pipeline_mode<synchronous>, transform_indices = @transform_3, window_bounds = array<i64: 128, 128>}, {pipeline_mode = #tpu.pipeline_mode<synchronous>, transform_indices = @transform_4, window_bounds = array<i64: 1, 128>}, {transform_indices = @transform_5, window_bounds = array<i64: 8, 128>}]} {
    %c0 = arith.constant 0 : index
    %c0_0 = arith.constant 0 : index
    %0 = vector.load %arg1[%c0, %c0_0] : memref<8x32xf32, #tpu.memory_space<vmem>>, vector<8x32xf32>
    %1 = arith.truncf %0 : vector<8x32xf32> to vector<8x32xbf16>
    %c0_1 = arith.constant 0 : index
    %c0_2 = arith.constant 0 : index
    %2 = vector.load %arg2[%c0_1, %c0_2] : memref<32x128xbf16, #tpu.memory_space<vmem>>, vector<32x128xbf16>
    %cst = arith.constant dense<0.000000e+00> : vector<8x128xf32>
    %3 = tpu.matmul %1, %2, %cst {dimension_numbers = #tpu.dot_dimension_numbers<[1], [0], [0], [1], [0, 0, 1, 1], [], []>} : vector<8x32xbf16>, vector<32x128xbf16>, vector<8x128xf32> -> vector<8x128xf32>
    %c0_3 = arith.constant 0 : index
    %c0_4 = arith.constant 0 : index
    %4 = vector.load %arg3[%c0_3, %c0_4] : memref<1x128xf32, #tpu.memory_space<vmem>>, vector<1x128xf32>
    %5 = vector.broadcast %4 : vector<1x128xf32> to vector<8x128xf32>
    %6 = arith.addf %3, %5 : vector<8x128xf32>
    %cst_5 = arith.constant 0.000000e+00 : f32
    %7 = vector.broadcast %cst_5 : f32 to vector<8x128xf32>
    %8 = arith.maximumf %6, %7 : vector<8x128xf32>
    %9 = arith.truncf %8 : vector<8x128xf32> to vector<8x128xbf16>
    %c0_6 = arith.constant 0 : index
    %c0_7 = arith.constant 0 : index
    %10 = vector.load %arg4[%c0_6, %c0_7] : memref<128x128xbf16, #tpu.memory_space<vmem>>, vector<128x128xbf16>
    %cst_8 = arith.constant dense<0.000000e+00> : vector<8x128xf32>
    %11 = tpu.matmul %9, %10, %cst_8 {dimension_numbers = #tpu.dot_dimension_numbers<[1], [0], [0], [1], [0, 0, 1, 1], [], []>} : vector<8x128xbf16>, vector<128x128xbf16>, vector<8x128xf32> -> vector<8x128xf32>
    %c0_9 = arith.constant 0 : index
    %c0_10 = arith.constant 0 : index
    %12 = vector.load %arg5[%c0_9, %c0_10] : memref<1x128xf32, #tpu.memory_space<vmem>>, vector<1x128xf32>
    %13 = vector.broadcast %12 : vector<1x128xf32> to vector<8x128xf32>
    %14 = arith.addf %11, %13 : vector<8x128xf32>
    %c0_11 = arith.constant 0 : index
    %c0_12 = arith.constant 0 : index
    %15 = vector.load %arg6[%c0_11, %c0_12] : memref<8x128xf32, #tpu.memory_space<vmem>>, vector<8x128xf32>
    tpu.vector_store %arg6[%c0_11, %c0_12], %14 {strides = array<i32>} : memref<8x128xf32, #tpu.memory_space<vmem>>, vector<8x128xf32>,
    return
  }
  func.func @transform_0(%arg0: i32) -> (i32, i32) {
    %c0_i32 = arith.constant 0 : i32
    %c0_i32_0 = arith.constant 0 : i32
    return %arg0, %c0_i32 : i32, i32
  }
  func.func @transform_1(%arg0: i32) -> (i32, i32) {
    %c0_i32 = arith.constant 0 : i32
    %c0_i32_0 = arith.constant 0 : i32
    %c0_i32_1 = arith.constant 0 : i32
    return %c0_i32, %c0_i32_0 : i32, i32
  }
  func.func @transform_2(%arg0: i32) -> (i32, i32) {
    %c0_i32 = arith.constant 0 : i32
    %c0_i32_0 = arith.constant 0 : i32
    %c0_i32_1 = arith.constant 0 : i32
    return %c0_i32, %c0_i32_0 : i32, i32
  }
  func.func @transform_3(%arg0: i32) -> (i32, i32) {
    %c0_i32 = arith.constant 0 : i32
    %c0_i32_0 = arith.constant 0 : i32
    %c0_i32_1 = arith.constant 0 : i32
    return %c0_i32, %c0_i32_0 : i32, i32
  }
  func.func @transform_4(%arg0: i32) -> (i32, i32) {
    %c0_i32 = arith.constant 0 : i32
    %c0_i32_0 = arith.constant 0 : i32
    %c0_i32_1 = arith.constant 0 : i32
    return %c0_i32, %c0_i32_0 : i32, i32
  }
  func.func @transform_5(%arg0: i32) -> (i32, i32) {
    %c0_i32 = arith.constant 0 : i32
    %c0_i32_0 = arith.constant 0 : i32
    return %arg0, %c0_i32 : i32, i32
  }
}

</mosaic_0001>

<bundles_post_ra>
// kernel: mlp_forward.1
= control target key start
LH: loop header
LB: loop body
LE: loop exit
PB: predicated region body
PF: predicated region fallthrough
CT: control target
= control target key end

     0   :  { %10 = vsyncpa [#allocation3], 0  ;;  %s523_s0 = inlined_call_operand.hbm [shape: f32[8,32], index: 0, kind: input, shape index: {}]   ;;  %s524_s1 = inlined_call_operand.hbm [shape: bf16[32,128], index: 1, kind: input, shape index: {}]   ;;  %s525_s2 = inlined_call_operand.vmem [shape: f32[1,128], index: 2, kind: input, shape index: {}]   ;;  %s526_s3 = inlined_call_operand.hbm [shape: bf16[128,128], index: 3, kind: input, shape index: {}]   ;;  %s527_s4 = inlined_call_operand.vmem [shape: f32[1,128], index: 4, kind: input, shape index: {}]   ;;  %s528_s5 = inlined_call_operand.hbm [shape: f32[8,128], index: 5, kind: output, shape index: {}]  }
   0x1   :  { %11 = vsyncpa [#allocation6], 0 }
   0x2   :  { %12 = vsyncpa [#allocation4], 0  ;;  %s425_s18 = smov [#allocation5]   ;;  %s331_s22 = scalar_lea.hbm %s524_s1, 256 }
   0x3   :  { %s28_s19 = sshll.u32 %s425_s18, 4  ;;  %p332_p0 = scmp.ne.s32.totalorder %s524_s1, %s331_s22  ;;  %s29_s19 = int_to_ptr.vmem [resolvable:$true] %s28_s19 }
   0x4   :  { %p335_p1 = scmp.lt.u32.totalorder %s331_s22, %s524_s1 }
   0x6   :  { %p337_p2 = pnand %p335_p1, %p332_p0 }
   0x8   :  { %340 = shalt.err (!%p337_p2)
}
   0x9   :  { %s341_s27 = scalar_lea.vmem %s29_s19, 256  ;;  %p346_p4 = scmp.lt.s32.totalorder %s29_s19, %s29_s19 }
   0xa   :  { %p342_p3 = scmp.ne.s32.totalorder %s29_s19, %s341_s27  ;;  %p347_p5 = scmp.lt.s32.totalorder %s341_s27, %s341_s27 }
   0xc   :  { %p348_p6 = por %p347_p5, %p346_p4 }
   0xe   :  { %p349_p7 = pnand %p348_p6, %p342_p3 }
  0x10   :  { %352 = shalt.err (!%p349_p7)
}
  0x11   :  { %s426_s28 = smov 64   ;;  %s427_s29 = smov 4  }
  0x12   :  { %34 = dma.hbm_to_vmem [thread:$0]  %s524_s1, 256, %s29_s19, [#allocation6], %s426_s28, %s426_s28, %s427_s29  }
  0x13   :  { %s428_s7 = smov [#allocation2]   ;;  %s429_s9 = smov [#allocation7]  }
  0x14   :  { %s19_s8 = sshll.u32 %s428_s7, 4  ;;  %s42_s10 = sshll.u32 %s429_s9, 4  ;;  %s20_s8 = int_to_ptr.vmem [resolvable:$true] %s19_s8  ;;  %s43_s10 = int_to_ptr.vmem [resolvable:$true] %s42_s10 }
  0x15   :  { %s353_s13 = scalar_lea.hbm %s523_s0, 128 }
  0x16   :  { %p354_p8 = scmp.ne.s32.totalorder %s523_s0, %s353_s13  ;;  %p357_p9 = scmp.lt.u32.totalorder %s353_s13, %s523_s0 }
  0x18   :  { %p359_p10 = pnand %p357_p9, %p354_p8 }
  0x1a   :  { %362 = shalt.err (!%p359_p10)
}
  0x1b   :  { %s363_s1 = scalar_lea.vmem %s20_s8, 128  ;;  %p368_p12 = scmp.lt.s32.totalorder %s20_s8, %s20_s8 }
  0x1c   :  { %p364_p11 = scmp.ne.s32.totalorder %s20_s8, %s363_s1  ;;  %p369_p13 = scmp.lt.s32.totalorder %s363_s1, %s363_s1 }
  0x1e   :  { %p370_p0 = por %p369_p13, %p368_p12 }
  0x20   :  { %p371_p1 = pnand %p370_p0, %p364_p11 }
  0x22   :  { %374 = shalt.err (!%p371_p1)
}
  0x23   :  { %22 = dma.hbm_to_vmem [thread:$0]  %s523_s0, 128, %s20_s8, [#allocation3]  }
  0x24   :  { %s375_s22 = scalar_lea.hbm %s526_s3, 1024 }
  0x25   :  { %p376_p2 = scmp.ne.s32.totalorder %s526_s3, %s375_s22  ;;  %p379_p3 = scmp.lt.u32.totalorder %s375_s22, %s526_s3 }
  0x27   :  { %p381_p4 = pnand %p379_p3, %p376_p2 }
  0x29   :  { %384 = shalt.err (!%p381_p4)
}
  0x2a   :  { %s385_s27 = scalar_lea.vmem %s43_s10, 1024  ;;  %p390_p6 = scmp.lt.s32.totalorder %s43_s10, %s43_s10 }
  0x2b   :  { %p386_p5 = scmp.ne.s32.totalorder %s43_s10, %s385_s27  ;;  %p391_p7 = scmp.lt.s32.totalorder %s385_s27, %s385_s27 }
  0x2d   :  { %p392_p8 = por %p391_p7, %p390_p6 }
  0x2f   :  { %p393_p9 = pnand %p392_p8, %p386_p5 }
  0x31   :  { %396 = shalt.err (!%p393_p9)
}
  0x32   :  { %48 = dma.hbm_to_vmem [thread:$0]  %s526_s3, 1024, %s43_s10, [#allocation6], %s426_s28, %s426_s28, %s427_s29  }
  0x33   :  { %419 = dma.done.wait [#allocation3], 128  }
  0x34   :  { %420 = vsyncadd [#allocation3], 4294967168 }
  0x35   :  { %421 = dma.done.wait [#allocation6], 1280  }
  0x36   :  { %422 = vsyncadd [#allocation6], 4294966016  ;;  %v430_v0 = vmov 0.0   ;;  %vm431_vm0 = vmmov 0   ;;  %v321_v1 = vld [vmem:[#allocation5] sm:$0xff]   ;;  %v322_v2 = vld [vmem:[#allocation5 + $0x8] sm:$0xff]  }
  0x37   :  { %285 = vmatprep.subr.bf16.mxu0 %v430_v0  ;;  %289 = vmatprep.mubr.msk.bf16.mxu0 %vm431_vm0, %v430_v0  ;;  %v61_v3 = vld [vmem:[#allocation2] sm:$0xff]  ;;  %v323_v4 = vld [vmem:[#allocation7] sm:$0xff]   ;;  %vm86_vm1 = vcmask 261120   ;;  %v325_v7 = vld [vmem:[#allocation7 + $0x10] sm:$0xff]   ;;  %s432_s7 = smov [#allocation8]  }
  0x38   :  { %293 = vmatprep.subr.bf16.mxu1 %v430_v0  ;;  %309 = vmatprep.mubr.msk.bf16.mxu1 %vm431_vm0, %v430_v0  ;;  %v62_v5 = vpack.c.bf16 %v61_v3, %v61_v3  ;;  %v324_v6 = vld [vmem:[#allocation7 + $0x8] sm:$0xff]   ;;  %v326_v8 = vld [vmem:[#allocation7 + $0x18] sm:$0xff]   ;;  %v327_v9 = vld [vmem:[#allocation7 + $0x20] sm:$0xff]   ;;  %s250_s8 = sshll.u32 %s432_s7, 4  ;;  %s251_s8 = int_to_ptr.vmem [resolvable:$true] %s250_s8 }
  0x39   :  { %286 = vmatpush3.bf16.msra.mxu0 %v321_v1  ;;  %294 = vmatpush3.bf16.msra.mxu1 %v323_v4  ;;  %v328_v10 = vld [vmem:[#allocation7 + $0x28] sm:$0xff]   ;;  %v329_v11 = vld [vmem:[#allocation7 + $0x30] sm:$0xff]   ;;  %v330_v12 = vld [vmem:[#allocation7 + $0x38] sm:$0xff]   ;;  %p402_p11 = scmp.lt.s32.totalorder %s251_s8, %s251_s8 }
  0x3a   :  { %287 = vmatprep.subr.bf16.mxu0 %v430_v0  ;;  %295 = vmatprep.subr.bf16.mxu1 %v430_v0  ;;  %v260_v13 = vld [vmem:[%s525_s2] ss:$0 sm:$0xff]  ;;  %s397_s2 = scalar_lea.vmem %s251_s8, 128 }
  0x3b   :  { %v264_v21 = vld [vmem:[%s527_s4] ss:$0 sm:$0xff]  ;;  %p398_p10 = scmp.ne.s32.totalorder %s251_s8, %s397_s2  ;;  %p403_p12 = scmp.lt.s32.totalorder %s397_s2, %s397_s2 }
  0x3d   :  { %288 = vmatpush3.bf16.msra.mxu0 %v322_v2  ;;  %296 = vmatpush3.bf16.msra.mxu1 %v324_v6  ;;  %p404_p13 = por %p403_p12, %p402_p11 }
  0x3e   :  { %297 = vmatprep.subr.bf16.mxu1 %v430_v0 }
  0x3f   :  { %p405_p0 = pnand %p404_p13, %p398_p10 }
  0x40   :  { %290 = vmatmul.mubr.msk.bf16.vlgmr.msra.gmra.mrb[0].mxu0 %vm86_vm1, %v62_v5 }
  0x41   :  { %298 = vmatpush3.bf16.msra.mxu1 %v325_v7 }
  0x42   :  { %299 = vmatprep.subr.bf16.mxu1 %v430_v0 }
  0x45   :  { %300 = vmatpush3.bf16.msra.mxu1 %v326_v8 }
  0x46   :  { %301 = vmatprep.subr.bf16.mxu1 %v430_v0 }
  0x49   :  { %302 = vmatpush3.bf16.msra.mxu1 %v327_v9 }
  0x4a   :  { %303 = vmatprep.subr.bf16.mxu1 %v430_v0 }
  0x4d   :  { %304 = vmatpush3.bf16.msra.mxu1 %v328_v10 }
  0x4e   :  { %305 = vmatprep.subr.bf16.mxu1 %v430_v0 }
  0x51   :  { %306 = vmatpush3.bf16.msra.mxu1 %v329_v11 }
  0x52   :  { %307 = vmatprep.subr.bf16.mxu1 %v430_v0 }
  0x55   :  { %308 = vmatpush3.bf16.msra.mxu1 %v330_v12 }
 0x113   :  { %v124_v14 = vpop.f32.mrb[0].mxu0 }
 0x114   :  { %v125_v15 = vadd.f32 %v260_v13, %v124_v14  ;;  %v291_v16 = vpop.f32.mrb[1].mxu0 }
 0x115   :  { %v127_v17 = vpop.f32.mrb[2].mxu0 }
 0x116   :  { %v130_v18 = vmax.f32 %v125_v15, 0.0  ;;  %v292_v19 = vpop.f32.mrb[3].mxu0 }
 0x118   :  { %v131_v20 = vpack.c.bf16 %v130_v18, %v130_v18 }
 0x11a   :  { %310 = vmatmul.mubr.bf16.vlgmr.msra.gmra.mrb[0].mxu1 %v131_v20 }
 0x1ed   :  { %v237_v22 = vpop.f32.mrb[0].mxu1 }
 0x1ee   :  { %v238_v23 = vadd.f32 %v264_v21, %v237_v22  ;;  %v311_v24 = vpop.f32.mrb[1].mxu1 }
 0x1ef   :  { %v240_v25 = vpop.f32.mrb[2].mxu1 }
 0x1f0   :  { %243 = vst [vmem:[#allocation8] sm:$0xff] %v238_v23  ;;  %v312_v26 = vpop.f32.mrb[3].mxu1 }
 0x1f1   :  { %408 = shalt.err (!%p405_p0)
}
 0x1f2   :  { %s409_s4 = scalar_lea.hbm %s528_s5, 128 }
 0x1f3   :  { %p410_p1 = scmp.ne.s32.totalorder %s528_s5, %s409_s4  ;;  %p413_p2 = scmp.lt.u32.totalorder %s409_s4, %s528_s5 }
 0x1f5   :  { %p415_p3 = pnand %p413_p2, %p410_p1 }
 0x1f7   :  { %418 = shalt.err (!%p415_p3)
}
 0x1f8   :  { %253 = dma.vmem_to_hbm [thread:$0]  %s251_s8, 128, %s528_s5, [#allocation4]  }
 0x1f9   :  { %423 = dma.done.wait [#allocation4], 128  }
 0x1fa   :  { %424 = vsyncadd [#allocation4], 4294967168 }
 0x1fb   :  { %257 = vsyncpa [#allocation3], 1 }
 0x1fc   :  { %258 = vsyncpa [#allocation6], 1 }
 0x1fd   :  { %259 = vsyncpa [#allocation4], 1 }

</bundles_post_ra>
